<compile_context>
chip_gen: v7x
topology: tpu7x:2x2x1
jax: 0.10.0
libtpu: 0.0.40
codegen_flags: <defaults>
</compile_context>

<pallas_src>
import jax
import jax.numpy as jnp
from jax.experimental import pallas as pl
from jax.experimental.pallas import tpu as pltpu

_LANE_CANDIDATES = (512, 256, 128)       # lane widths (multiples of 128 -> unmasked vst)
_TARGET_BLOCK_BYTES = 4 * 1024 * 1024    # ~4 MiB per block buffer (dtype-aware rows)
_VMEM_LIMIT_BYTES = 32 * 1024 * 1024     # 2 bufs x (in+out) ~16 MiB resident < 32 MiB
_MIN_PALLAS_BYTES = 1 << 20              # below ~1 MiB launch/step overhead dominates


def _scale_kernel(scale_ref, x_ref, o_ref):
    # scale_ref: SMEM (1,) f32 scalar parameter; x_ref/o_ref: VMEM tiles.
    # Multiply in the tile's native dtype (bf16 VALU on v6e/v7x), cast on store.
    s = scale_ref[0].astype(x_ref.dtype)
    o_ref[...] = (x_ref[...] * s).astype(o_ref.dtype)


def scale_forward(x: jax.Array, scale, *,
                  min_pallas_bytes: int = _MIN_PALLAS_BYTES,
                  donate_x: bool = False) -> jax.Array:
    """Forward of FCOS Scale: x * scale.  x: any-rank array; scale: f32 scalar."""
    orig_shape = x.shape
    orig_dtype = x.dtype
    total = x.size
    itemsize = x.dtype.itemsize

    scale_f32 = jnp.asarray(scale, dtype=jnp.float32)

    def _xla_fallback():
        # Plain elementwise multiply: XLA's fused loop is already HBM-roofline.
        return x * scale_f32.astype(orig_dtype)

    # Small-size fast path: skip pallas_call fixed costs for tiny feature maps.
    if total == 0 or total * itemsize < min_pallas_bytes:
        return _xla_fallback()

    # Pick a lane width that divides the flat size exactly -> no pad, no slice.
    lane = next((l for l in _LANE_CANDIDATES if total % l == 0), None)
    if lane is None:
        # Ragged total (not a multiple of 128) — rare for NCHW feature maps.
        # TODO(synk): could handle via a masked pltpu.store on the tail block;
        # plain XLA is already memory-bound optimal for this elementwise op.
        return _xla_fallback()

    rows = total // lane

    # Dtype-aware row tile targeting ~4 MiB per block buffer (multiple of 8 rows).
    tile_r = max((_TARGET_BLOCK_BYTES // (lane * itemsize)) // 8 * 8, 8)
    if rows <= tile_r:
        tile_r = rows                       # single block == full array dims
    n_blocks = pl.cdiv(rows, tile_r)        # partial boundary block is masked by Pallas

    # Contiguous reshape: metadata-only (bitcast), no extra HBM traffic.
    x2d = x.reshape(rows, lane)
    scale_arr = scale_f32.reshape(1)

    out2d = pl.pallas_call(
        _scale_kernel,
        out_shape=jax.ShapeDtypeStruct((rows, lane), orig_dtype),
        grid_spec=pl.GridSpec(
            grid=(n_blocks,),
            in_specs=[
                pl.BlockSpec(memory_space=pltpu.SMEM),            # scalar parameter
                pl.BlockSpec((tile_r, lane), lambda i: (i, 0)),   # input row tile
            ],
            out_specs=pl.BlockSpec((tile_r, lane), lambda i: (i, 0)),
        ),
        compiler_params=pltpu.CompilerParams(
            # "parallel" vs "arbitrary" is a codegen no-op; on v7x consider
            # pltpu.CORE_PARALLEL (or pl.core_map) if only one TC is streaming.
            dimension_semantics=("parallel",),
            vmem_limit_bytes=_VMEM_LIMIT_BYTES,
        ),
        # Reuse x's HBM buffer for the output when the caller can donate it.
        input_output_aliases=({1: 0} if donate_x else {}),
    )(scale_arr, x2d)

    return out2d.reshape(orig_shape)


if __name__ == "__main__":
    key = jax.random.PRNGKey(0)

    # Deterministic parameter init, matching nn.Parameter(torch.tensor(1.0)).
    init_value = 1.0
    scale_param = jnp.float32(init_value)

    # Primary check: small NCHW regression map, forced through the Pallas path
    # (min_pallas_bytes=0) so the kernel itself is exercised.
    x = jax.random.normal(key, (2, 4, 16, 16), dtype=jnp.float32)
    out = jax.block_until_ready(scale_forward(x, scale_param, min_pallas_bytes=0))
    assert out.shape == x.shape and out.dtype == x.dtype
    assert jnp.allclose(out, x * scale_param, atol=1e-6, rtol=1e-6)

    k1, k2, k3 = jax.random.split(key, 3)
    scale2 = jnp.float32(0.75)

    # Multi-tile path with a masked partial boundary block (rows % tile_r != 0),
    # default thresholds (goes through the Pallas kernel, no pad / no slice).
    x2 = jax.random.normal(k1, (8, 4, 136, 256), dtype=jnp.float32)   # 2176 rows of 512
    out2 = jax.block_until_ready(scale_forward(x2, scale2))
    assert jnp.allclose(out2, x2 * scale2, atol=1e-6, rtol=1e-6)

    # bf16 path: native-dtype multiply inside the kernel (single block).
    x3 = jax.random.normal(k2, (4, 4, 64, 128), dtype=jnp.bfloat16)
    out3 = jax.block_until_ready(scale_forward(x3, scale2, min_pallas_bytes=0))
    ref3 = x3 * scale2.astype(jnp.bfloat16)
    assert out3.dtype == jnp.bfloat16
    assert jnp.allclose(out3.astype(jnp.float32), ref3.astype(jnp.float32),
                        atol=1e-2, rtol=1e-2)

    # Ragged total (not a multiple of 128) -> XLA fallback path.
    x4 = jax.random.normal(k3, (2, 4, 17, 15), dtype=jnp.float32)
    out4 = jax.block_until_ready(scale_forward(x4, scale2, min_pallas_bytes=0))
    assert jnp.allclose(out4, x4 * scale2, atol=1e-6, rtol=1e-6)

    # Tiny input with defaults -> small-size fast path.
    out5 = jax.block_until_ready(scale_forward(x, scale2))
    assert jnp.allclose(out5, x * scale2, atol=1e-6, rtol=1e-6)

    print("KERNEL_OK")
</pallas_src>

<mosaic_0001>
module attributes {stable_mosaic.version = 11 : i64} {
  func.func @_scale_kernel(%arg0: i32, %arg1: memref<1xf32, #tpu.memory_space<smem>>, %arg2: memref<4x512xf32, #tpu.memory_space<vmem>>, %arg3: memref<4x512xf32, #tpu.memory_space<vmem>>) attributes {dimension_semantics = [#tpu.dimension_semantics<parallel>], iteration_bounds = array<i64: 1>, scalar_prefetch = 0 : i64, scratch_operands = 0 : i64, tpu.core_type = #tpu.core_type<tc>, window_params = [{transform_indices = @transform_0, window_bounds = array<i64: 1>}, {transform_indices = @transform_1, window_bounds = array<i64: 4, 512>}, {transform_indices = @transform_2, window_bounds = array<i64: 4, 512>}]} {
    %c0 = arith.constant 0 : index
    %0 = memref.load %arg1[%c0] : memref<1xf32, #tpu.memory_space<smem>>
    %c0_0 = arith.constant 0 : index
    %c0_1 = arith.constant 0 : index
    %1 = vector.load %arg2[%c0_0, %c0_1] : memref<4x512xf32, #tpu.memory_space<vmem>>, vector<4x512xf32>
    %2 = vector.broadcast %0 : f32 to vector<4x512xf32>
    %3 = arith.mulf %1, %2 : vector<4x512xf32>
    %c0_2 = arith.constant 0 : index
    %c0_3 = arith.constant 0 : index
    %4 = vector.load %arg3[%c0_2, %c0_3] : memref<4x512xf32, #tpu.memory_space<vmem>>, vector<4x512xf32>
    tpu.vector_store %arg3[%c0_2, %c0_3], %3 {strides = array<i32>} : memref<4x512xf32, #tpu.memory_space<vmem>>, vector<4x512xf32>,
    return
  }
  func.func @transform_0(%arg0: i32) -> i32 {
    %c0_i32 = arith.constant 0 : i32
    %c0_i32_0 = arith.constant 0 : i32
    return %c0_i32 : i32
  }
  func.func @transform_1(%arg0: i32) -> (i32, i32) {
    %c0_i32 = arith.constant 0 : i32
    %c0_i32_0 = arith.constant 0 : i32
    return %arg0, %c0_i32 : i32, i32
  }
  func.func @transform_2(%arg0: i32) -> (i32, i32) {
    %c0_i32 = arith.constant 0 : i32
    %c0_i32_0 = arith.constant 0 : i32
    return %arg0, %c0_i32 : i32, i32
  }
}

</mosaic_0001>

<bundles_post_ra>
// kernel: tpu_custom_call.1
= control target key start
LH: loop header
LB: loop body
LE: loop exit
PB: predicated region body
PF: predicated region fallthrough
CT: control target
= control target key end

     0   :  { %8 = vsyncpa [#allocation4], 0  ;;  %s142_s0 = inlined_call_operand.<no memory space> [shape: f32[1], index: 0, kind: input, shape index: {}]   ;;  %s143_s1 = inlined_call_operand.hbm [shape: f32[4,512], index: 1, kind: input, shape index: {}]   ;;  %s144_s2 = inlined_call_operand.hbm [shape: f32[4,512], index: 2, kind: output, shape index: {}]  }
   0x1   :  { %9 = vsyncpa [#allocation5], 0  ;;  %s98_s9 = smov [#allocation3]   ;;  %s50_s13 = scalar_lea.hbm %s143_s1, 256 }
   0x2   :  { %s18_s10 = sshll.u32 %s98_s9, 4  ;;  %p51_p0 = scmp.ne.s32.totalorder %s143_s1, %s50_s13  ;;  %s19_s10 = int_to_ptr.vmem [resolvable:$true] %s18_s10 }
   0x3   :  { %p54_p1 = scmp.lt.u32.totalorder %s50_s13, %s143_s1 }
   0x5   :  { %p56_p2 = pnand %p54_p1, %p51_p0 }
   0x7   :  { %59 = shalt.err (!%p56_p2)
}
   0x8   :  { %s60_s18 = scalar_lea.vmem %s19_s10, 256  ;;  %p65_p4 = scmp.lt.s32.totalorder %s19_s10, %s19_s10 }
   0x9   :  { %p61_p3 = scmp.ne.s32.totalorder %s19_s10, %s60_s18  ;;  %p66_p5 = scmp.lt.s32.totalorder %s60_s18, %s60_s18 }
   0xb   :  { %p67_p6 = por %p66_p5, %p65_p4 }
   0xd   :  { %p68_p7 = pnand %p67_p6, %p61_p3 }
   0xf   :  { %71 = shalt.err (!%p68_p7)
}
  0x10   :  { %21 = dma.hbm_to_vmem [thread:$0]  %s143_s1, 256, %s19_s10, [#allocation4]  }
  0x11   :  { %94 = dma.done.wait [#allocation4], 256  }
  0x12   :  { %95 = vsyncadd [#allocation4], 4294967040  ;;  %v28_v0 = vstv %s142_s0  ;;  %s99_s23 = smov [#allocation6]   ;;  %v26_v1 = vld [vmem:[#allocation3] sm:$0xff]  ;;  %v27_v2 = vld [vmem:[#allocation3 + $0x8] sm:$0xff] }
  0x13   :  { %s39_s24 = sshll.u32 %s99_s23, 4  ;;  %v29_v3 = vmul.f32 %v28_v0, %v26_v1  ;;  %v30_v4 = vmul.f32 %v28_v0, %v27_v2  ;;  %s40_s24 = int_to_ptr.vmem [resolvable:$true] %s39_s24 }
  0x14   :  { %s72_s25 = scalar_lea.vmem %s40_s24, 256  ;;  %p77_p9 = scmp.lt.s32.totalorder %s40_s24, %s40_s24 }
  0x15   :  { %31 = vst [vmem:[#allocation6] sm:$0xff] %v29_v3  ;;  %32 = vst [vmem:[#allocation6 + $0x8] sm:$0xff] %v30_v4  ;;  %p73_p8 = scmp.ne.s32.totalorder %s40_s24, %s72_s25  ;;  %p78_p10 = scmp.lt.s32.totalorder %s72_s25, %s72_s25 }
  0x17   :  { %p79_p11 = por %p78_p10, %p77_p9 }
  0x19   :  { %p80_p12 = pnand %p79_p11, %p73_p8 }
  0x1b   :  { %83 = shalt.err (!%p80_p12)
}
  0x1c   :  { %s84_s0 = scalar_lea.hbm %s144_s2, 256 }
  0x1d   :  { %p85_p13 = scmp.ne.s32.totalorder %s144_s2, %s84_s0  ;;  %p88_p0 = scmp.lt.u32.totalorder %s84_s0, %s144_s2 }
  0x1f   :  { %p90_p1 = pnand %p88_p0, %p85_p13 }
  0x21   :  { %93 = shalt.err (!%p90_p1)
}
  0x22   :  { %42 = dma.vmem_to_hbm [thread:$0]  %s40_s24, 256, %s144_s2, [#allocation5]  }
  0x23   :  { %96 = dma.done.wait [#allocation5], 256  }
  0x24   :  { %97 = vsyncadd [#allocation5], 4294967040 }
  0x25   :  { %46 = vsyncpa [#allocation4], 1 }
  0x26   :  { %47 = vsyncpa [#allocation5], 1 }

</bundles_post_ra>
